<compile_context>
chip_gen: v5e
topology: v5e:2x2
jax: 0.10.0
libtpu: 0.0.40
codegen_flags: <defaults>
</compile_context>

<pallas_src>
import jax
import jax.numpy as jnp
from jax.experimental import pallas as pl
from jax.experimental.pallas import tpu as pltpu


def _round_up(x: int, m: int) -> int:
    return ((x + m - 1) // m) * m


def _two_mlp_head_kernel(x_ref, w6_ref, b6_ref, w7_ref, b7_ref, out_ref, acc_ref):
    """grid = (m_tiles, k_tiles); k is the fc6 contraction (reduction) axis.

    x_ref   : (tm, tk)      bf16  -- ROI-feature tile
    w6_ref  : (tk, rep1)    bf16  -- fc6 weight K-tile, (in, out) layout
    b6_ref  : (1, rep1)     f32   -- grid-invariant, single-buffered
    w7_ref  : (rep1, rep2)  bf16  -- grid-invariant, single-buffered
    b7_ref  : (1, rep2)     f32   -- grid-invariant, single-buffered
    out_ref : (tm, rep2)    f32   -- same block revisited for every k
    acc_ref : (tm, rep1)    f32   -- fc6 accumulator scratch
    """
    k = pl.program_id(1)

    @pl.when(k == 0)
    def _init():
        acc_ref[...] = jnp.zeros_like(acc_ref)

    # fc6 partial product on the MXU (bf16 x bf16 -> f32 accumulate).
    acc_ref[...] += jnp.dot(x_ref[...], w6_ref[...],
                            preferred_element_type=jnp.float32)

    @pl.when(k == pl.num_programs(1) - 1)
    def _epilogue():
        # bias + ReLU in f32 on the VPU.
        h = jnp.maximum(acc_ref[...] + b6_ref[...], 0.0)
        # fc7 on the MXU (bf16 inputs, f32 accumulation), then bias + ReLU.
        y = jnp.dot(h.astype(w7_ref.dtype), w7_ref[...],
                    preferred_element_type=jnp.float32)
        y = jnp.maximum(y + b7_ref[...], 0.0)
        out_ref[...] = y.astype(out_ref.dtype)


def prepare_params(w6, b6, w7, b7, *, block_k=512, matmul_dtype=jnp.bfloat16):
    """One-time parameter preparation (call at load time, NOT per forward).

    Transposes nn.Linear weights to (in, out) layout, casts matmul operands to
    bf16 (MXU fast path, half the HBM traffic / VMEM footprint), reshapes
    biases to (1, rep) f32 rows, and zero-pads the fc6 contraction dim up to a
    multiple of the K tile, so no weight reshuffling ever happens per call.
    """
    rep1, in_ch = w6.shape
    rep2 = w7.shape[0]
    block_k = _round_up(min(block_k, _round_up(in_ch, 128)), 128)
    k_pad = _round_up(in_ch, block_k)

    w6_t = jnp.transpose(w6).astype(matmul_dtype)        # (in_ch, rep1)
    w6_t = jnp.pad(w6_t, ((0, k_pad - in_ch), (0, 0)))   # zero-pad K (exact)
    w7_t = jnp.transpose(w7).astype(matmul_dtype)        # (rep1, rep2)
    return {
        "w6": w6_t,
        "b6": b6.reshape(1, rep1).astype(jnp.float32),
        "w7": w7_t,
        "b7": b7.reshape(1, rep2).astype(jnp.float32),
        "in_channels": in_ch,
        "block_k": block_k,
    }


def two_mlp_head(x_nchw, params, *, block_m=256):
    """Forward pass of TwoMLPHead: relu(fc7(relu(fc6(flatten(x)))))."""
    n = x_nchw.shape[0]
    x2d = x_nchw.reshape(n, -1)                 # == torch flatten(start_dim=1)
    in_ch = params["in_channels"]
    assert x2d.shape[1] == in_ch, (x2d.shape, in_ch)

    w6, b6, w7, b7 = params["w6"], params["b6"], params["w7"], params["b7"]
    block_k = params["block_k"]
    k_pad, rep1 = w6.shape
    rep2 = w7.shape[1]
    mm_dtype = w6.dtype
    mm_bytes = w6.dtype.itemsize

    # Row (ROI) tile: big MXU-friendly tiles for real workloads (N ~ 512-1024
    # ROIs), but don't over-pad tiny batches (round up to the bf16 sublane
    # granule of 16 instead).
    tm = min(_round_up(block_m, 16), _round_up(n, 16))
    m_pad = _round_up(n, tm)

    # Cast activations to the matmul dtype and zero-pad M / K; zero padding
    # does not change the matmuls and padded rows are sliced off at the end.
    x2d = jnp.pad(x2d.astype(mm_dtype), ((0, m_pad - n), (0, k_pad - in_ch)))

    grid = (m_pad // tm, k_pad // block_k)

    # Per-step VMEM working set (streamed tiles double-buffered, resident
    # operands single-buffered); set an explicit scoped-VMEM limit with
    # headroom, capped at v7x's 64 MiB physical VMEM per TensorCore.
    vmem_working = (
        2 * tm * block_k * mm_bytes          # x tiles (double-buffered)
        + 2 * block_k * rep1 * mm_bytes      # W6 tiles (double-buffered)
        + rep1 * rep2 * mm_bytes             # W7 (resident, single buffer)
        + (rep1 + rep2) * 4                  # biases
        + tm * rep1 * 4                      # f32 accumulator scratch
        + 2 * tm * rep2 * 4                  # output tiles
    )
    vmem_limit = int(min(max(2 * vmem_working, 32 * 1024 * 1024),
                         64 * 1024 * 1024))

    cost = pl.CostEstimate(
        flops=2 * m_pad * (k_pad * rep1 + rep1 * rep2),
        transcendentals=0,
        bytes_accessed=int(x2d.size * mm_bytes
                           + grid[0] * w6.size * mm_bytes  # W6 streamed per row tile
                           + w7.size * mm_bytes
                           + (b6.size + b7.size) * 4
                           + m_pad * rep2 * 4),
    )

    out = pl.pallas_call(
        _two_mlp_head_kernel,
        out_shape=jax.ShapeDtypeStruct((m_pad, rep2), jnp.float32),
        grid_spec=pltpu.PrefetchScalarGridSpec(
            num_scalar_prefetch=0,
            grid=grid,
            in_specs=[
                # x: stream (M, K) tiles.
                pl.BlockSpec((tm, block_k), lambda m, k: (m, k)),
                # W6: stream K tiles (re-streamed per row tile).
                pl.BlockSpec((block_k, rep1), lambda m, k: (k, 0)),
                # Grid-invariant operands: single VMEM buffer (default 2-deep
                # pipelining would double their footprint for zero benefit).
                pl.BlockSpec((1, rep1), lambda m, k: (0, 0),
                             pipeline_mode=pl.Buffered(1)),          # b6
                pl.BlockSpec((rep1, rep2), lambda m, k: (0, 0),
                             pipeline_mode=pl.Buffered(1)),          # W7
                pl.BlockSpec((1, rep2), lambda m, k: (0, 0),
                             pipeline_mode=pl.Buffered(1)),          # b7
            ],
            # Same output block for every k -> accumulator-resident output.
            out_specs=pl.BlockSpec((tm, rep2), lambda m, k: (m, 0)),
            scratch_shapes=[pltpu.VMEM((tm, rep1), jnp.float32)],
        ),
        compiler_params=pltpu.CompilerParams(
            dimension_semantics=("parallel", "arbitrary"),
            vmem_limit_bytes=vmem_limit,
        ),
        cost_estimate=cost,
    )(x2d, w6, b6, w7, b7)

    return out[:n]


def _reference(x_nchw, w6, b6, w7, b7, matmul_dtype=jnp.float32):
    """Pure-JAX reference matching the PyTorch forward (optionally with the
    same bf16-matmul / f32-accumulate numerics as the kernel)."""
    n = x_nchw.shape[0]
    x = x_nchw.reshape(n, -1)
    h = jnp.dot(x.astype(matmul_dtype), w6.T.astype(matmul_dtype),
                preferred_element_type=jnp.float32) + b6
    h = jnp.maximum(h, 0.0)
    y = jnp.dot(h.astype(matmul_dtype), w7.T.astype(matmul_dtype),
                preferred_element_type=jnp.float32) + b7
    return jnp.maximum(y, 0.0)


if __name__ == "__main__":
    # Small shapes consistent with the module: NCHW pooled ROI features.
    N, C, H, W = 2, 4, 16, 16
    in_channels = C * H * W            # 1024
    rep1, rep2 = 256, 128

    key = jax.random.PRNGKey(0)
    kx, k6w, k6b, k7w, k7b = jax.random.split(key, 5)

    x = jax.random.normal(kx, (N, C, H, W), dtype=jnp.float32)
    # nn.Linear parameter layouts: weight (out, in), bias (out,).
    w6 = jax.random.normal(k6w, (rep1, in_channels), dtype=jnp.float32) * 0.02
    b6 = jax.random.normal(k6b, (rep1,), dtype=jnp.float32) * 0.01
    w7 = jax.random.normal(k7w, (rep2, rep1), dtype=jnp.float32) * 0.02
    b7 = jax.random.normal(k7b, (rep2,), dtype=jnp.float32) * 0.01

    # One-time parameter prep (transpose + bf16 cast + K padding): off hot path.
    params = prepare_params(w6, b6, w7, b7, block_k=512)

    out = two_mlp_head(x, params, block_m=256)
    out = jax.block_until_ready(out)
    assert out.shape == (N, rep2), out.shape

    # Check against a reference using the same bf16-input / f32-accum numerics.
    ref_bf16 = _reference(x, w6, b6, w7, b7, matmul_dtype=jnp.bfloat16)
    assert jnp.allclose(out, ref_bf16, atol=2e-2, rtol=2e-2), "mismatch vs bf16 ref"

    # Sanity check vs the exact f32 PyTorch-equivalent forward (looser tol:
    # the kernel deliberately runs the matmuls with bf16 inputs).
    ref_f32 = _reference(x, w6, b6, w7, b7, matmul_dtype=jnp.float32)
    assert jnp.allclose(out, ref_f32, atol=5e-2, rtol=5e-2), "mismatch vs f32 ref"

    print("KERNEL_OK")
</pallas_src>

<mosaic_0001>
module attributes {stable_mosaic.version = 11 : i64} {
  func.func @_two_mlp_head_kernel(%arg0: i32, %arg1: i32, %arg2: memref<16x512xbf16, #tpu.memory_space<vmem>>, %arg3: memref<512x256xbf16, #tpu.memory_space<vmem>>, %arg4: memref<1x256xf32, #tpu.memory_space<vmem>>, %arg5: memref<256x128xbf16, #tpu.memory_space<vmem>>, %arg6: memref<1x128xf32, #tpu.memory_space<vmem>>, %arg7: memref<16x128xf32, #tpu.memory_space<vmem>>, %arg8: memref<16x256xf32, #tpu.memory_space<vmem>>) attributes {dimension_semantics = [#tpu.dimension_semantics<parallel>, #tpu.dimension_semantics<arbitrary>], iteration_bounds = array<i64: 1, 2>, scalar_prefetch = 0 : i64, scratch_operands = 1 : i64, tpu.core_type = #tpu.core_type<tc>, window_params = [{transform_indices = @transform_0, window_bounds = array<i64: 16, 512>}, {transform_indices = @transform_1, window_bounds = array<i64: 512, 256>}, {pipeline_mode = #tpu.pipeline_mode<synchronous>, transform_indices = @transform_2, window_bounds = array<i64: 1, 256>}, {pipeline_mode = #tpu.pipeline_mode<synchronous>, transform_indices = @transform_3, window_bounds = array<i64: 256, 128>}, {pipeline_mode = #tpu.pipeline_mode<synchronous>, transform_indices = @transform_4, window_bounds = array<i64: 1, 128>}, {transform_indices = @transform_5, window_bounds = array<i64: 16, 128>}]} {
    %c0_i32 = arith.constant 0 : i32
    %0 = arith.cmpi eq, %arg1, %c0_i32 : i32
    %1 = arith.extui %0 : i1 to i32
    %c0_i32_0 = arith.constant 0 : i32
    %2 = arith.cmpi ne, %1, %c0_i32_0 : i32
    scf.if %2 {
      %cst_9 = arith.constant 0.000000e+00 : f32
      %12 = vector.broadcast %cst_9 : f32 to vector<16x256xf32>
      %c0_10 = arith.constant 0 : index
      %c0_11 = arith.constant 0 : index
      %13 = vector.load %arg8[%c0_10, %c0_11] : memref<16x256xf32, #tpu.memory_space<vmem>>, vector<16x256xf32>
      tpu.vector_store %arg8[%c0_10, %c0_11], %12 {strides = array<i32>} : memref<16x256xf32, #tpu.memory_space<vmem>>, vector<16x256xf32>,
    } else {
    }
    %c0 = arith.constant 0 : index
    %c0_1 = arith.constant 0 : index
    %3 = vector.load %arg8[%c0, %c0_1] : memref<16x256xf32, #tpu.memory_space<vmem>>, vector<16x256xf32>
    %c0_2 = arith.constant 0 : index
    %c0_3 = arith.constant 0 : index
    %4 = vector.load %arg2[%c0_2, %c0_3] : memref<16x512xbf16, #tpu.memory_space<vmem>>, vector<16x512xbf16>
    %c0_4 = arith.constant 0 : index
    %c0_5 = arith.constant 0 : index
    %5 = vector.load %arg3[%c0_4, %c0_5] : memref<512x256xbf16, #tpu.memory_space<vmem>>, vector<512x256xbf16>
    %cst = arith.constant dense<0.000000e+00> : vector<16x256xf32>
    %6 = tpu.matmul %4, %5, %cst {dimension_numbers = #tpu.dot_dimension_numbers<[1], [0], [0], [1], [0, 0, 1, 1], [], []>} : vector<16x512xbf16>, vector<512x256xbf16>, vector<16x256xf32> -> vector<16x256xf32>
    %7 = arith.addf %3, %6 : vector<16x256xf32>
    %c0_6 = arith.constant 0 : index
    %c0_7 = arith.constant 0 : index
    %8 = vector.load %arg8[%c0_6, %c0_7] : memref<16x256xf32, #tpu.memory_space<vmem>>, vector<16x256xf32>
    tpu.vector_store %arg8[%c0_6, %c0_7], %7 {strides = array<i32>} : memref<16x256xf32, #tpu.memory_space<vmem>>, vector<16x256xf32>,
    %c1_i32 = arith.constant 1 : i32
    %9 = arith.cmpi eq, %arg1, %c1_i32 : i32
    %10 = arith.extui %9 : i1 to i32
    %c0_i32_8 = arith.constant 0 : i32
    %11 = arith.cmpi ne, %10, %c0_i32_8 : i32
    scf.if %11 {
      %c0_9 = arith.constant 0 : index
      %c0_10 = arith.constant 0 : index
      %12 = vector.load %arg8[%c0_9, %c0_10] : memref<16x256xf32, #tpu.memory_space<vmem>>, vector<16x256xf32>
      %c0_11 = arith.constant 0 : index
      %c0_12 = arith.constant 0 : index
      %13 = vector.load %arg4[%c0_11, %c0_12] : memref<1x256xf32, #tpu.memory_space<vmem>>, vector<1x256xf32>
      %14 = vector.broadcast %13 : vector<1x256xf32> to vector<16x256xf32>
      %15 = arith.addf %12, %14 : vector<16x256xf32>
      %cst_13 = arith.constant 0.000000e+00 : f32
      %16 = vector.broadcast %cst_13 : f32 to vector<16x256xf32>
      %17 = arith.maximumf %15, %16 : vector<16x256xf32>
      %18 = arith.truncf %17 : vector<16x256xf32> to vector<16x256xbf16>
      %c0_14 = arith.constant 0 : index
      %c0_15 = arith.constant 0 : index
      %19 = vector.load %arg5[%c0_14, %c0_15] : memref<256x128xbf16, #tpu.memory_space<vmem>>, vector<256x128xbf16>
      %cst_16 = arith.constant dense<0.000000e+00> : vector<16x128xf32>
      %20 = tpu.matmul %18, %19, %cst_16 {dimension_numbers = #tpu.dot_dimension_numbers<[1], [0], [0], [1], [0, 0, 1, 1], [], []>} : vector<16x256xbf16>, vector<256x128xbf16>, vector<16x128xf32> -> vector<16x128xf32>
      %c0_17 = arith.constant 0 : index
      %c0_18 = arith.constant 0 : index
      %21 = vector.load %arg6[%c0_17, %c0_18] : memref<1x128xf32, #tpu.memory_space<vmem>>, vector<1x128xf32>
      %22 = vector.broadcast %21 : vector<1x128xf32> to vector<16x128xf32>
      %23 = arith.addf %20, %22 : vector<16x128xf32>
      %cst_19 = arith.constant 0.000000e+00 : f32
      %24 = vector.broadcast %cst_19 : f32 to vector<16x128xf32>
      %25 = arith.maximumf %23, %24 : vector<16x128xf32>
      %c0_20 = arith.constant 0 : index
      %c0_21 = arith.constant 0 : index
      %26 = vector.load %arg7[%c0_20, %c0_21] : memref<16x128xf32, #tpu.memory_space<vmem>>, vector<16x128xf32>
      tpu.vector_store %arg7[%c0_20, %c0_21], %25 {strides = array<i32>} : memref<16x128xf32, #tpu.memory_space<vmem>>, vector<16x128xf32>,
    } else {
    }
    return
  }
  func.func @transform_0(%arg0: i32, %arg1: i32) -> (i32, i32) {
    %c0_i32 = arith.constant 0 : i32
    return %arg0, %arg1 : i32, i32
  }
  func.func @transform_1(%arg0: i32, %arg1: i32) -> (i32, i32) {
    %c0_i32 = arith.constant 0 : i32
    %c0_i32_0 = arith.constant 0 : i32
    return %arg1, %c0_i32 : i32, i32
  }
  func.func @transform_2(%arg0: i32, %arg1: i32) -> (i32, i32) {
    %c0_i32 = arith.constant 0 : i32
    %c0_i32_0 = arith.constant 0 : i32
    %c0_i32_1 = arith.constant 0 : i32
    return %c0_i32, %c0_i32_0 : i32, i32
  }
  func.func @transform_3(%arg0: i32, %arg1: i32) -> (i32, i32) {
    %c0_i32 = arith.constant 0 : i32
    %c0_i32_0 = arith.constant 0 : i32
    %c0_i32_1 = arith.constant 0 : i32
    return %c0_i32, %c0_i32_0 : i32, i32
  }
  func.func @transform_4(%arg0: i32, %arg1: i32) -> (i32, i32) {
    %c0_i32 = arith.constant 0 : i32
    %c0_i32_0 = arith.constant 0 : i32
    %c0_i32_1 = arith.constant 0 : i32
    return %c0_i32, %c0_i32_0 : i32, i32
  }
  func.func @transform_5(%arg0: i32, %arg1: i32) -> (i32, i32) {
    %c0_i32 = arith.constant 0 : i32
    %c0_i32_0 = arith.constant 0 : i32
    return %arg0, %c0_i32 : i32, i32
  }
}

</mosaic_0001>

<bundles_post_ra>
// kernel: tpu_custom_call.1
= control target key start
LH: loop header
LB: loop body
LE: loop exit
PB: predicated region body
PF: predicated region fallthrough
CT: control target
= control target key end

     0   :  { %s2282_s0 = inlined_call_operand.hbm [shape: bf16[16,1024], index: 0, kind: input, shape index: {}]   ;;  %s2283_s1 = inlined_call_operand.hbm [shape: bf16[1024,256], index: 1, kind: input, shape index: {}]   ;;  %s2284_s2 = inlined_call_operand.hbm [shape: f32[1,256], index: 2, kind: input, shape index: {}]   ;;  %s2285_s3 = inlined_call_operand.hbm [shape: bf16[256,128], index: 3, kind: input, shape index: {}]   ;;  %s2286_s4 = inlined_call_operand.vmem [shape: f32[1,128], index: 4, kind: input, shape index: {}]   ;;  %s2287_s5 = inlined_call_operand.hbm [shape: f32[16,128], index: 5, kind: output, shape index: {}]  }
   0x1   :  { %2289 = sst [smem:[#allocation19_spill]] %s2282_s0 }
   0x2   :  { %2290 = sst [smem:[#allocation20_spill]] %s2284_s2 }
   0x3   :  { %2291 = sst [smem:[#allocation21_spill]] %s2285_s3 }
   0x4   :  { %10 = vsyncpa [#allocation4], 0 }
   0x5   :  { %12 = vsyncpa [#allocation4 + $0x1], 0 }
   0x6   :  { %13 = vsyncpa [#allocation7], 0 }
   0x7   :  { %15 = vsyncpa [#allocation7 + $0x1], 0 }
   0x8   :  { %16 = vsyncpa [#allocation10], 0 }
   0x9   :  { %17 = vsyncpa [#allocation5], 0  ;;  %s1985_s18 = smov 0   ;;  %s1987_s19 = smov 0  }
   0xa   :  { %s1989_s20 = smov 0   ;;  %s1991_s21 = smov 0  }
   0xb   :  { %s1993_s22 = smov 0   ;;  %s1995_s23 = smov 0  }
   0xc LB: > { %s2014_s24 = sadd.s32 4294967295, %s1940_s23   ;;  %s44_s25 = sadd.s32 1, %s1928_s20  ;;  %s1940_s23 = sphi %s1995_s23, %s23_s23   ;;  %s1936_s22 = sphi %s1993_s22, %s2307_s22   ;;  %s1932_s21 = sphi %s1991_s21, %s2306_s21   ;;  %s1928_s20 = sphi %s1989_s20, %s2305_s20   ;;  %s1924_s19 = sphi %s1987_s19, %s2304_s19   ;;  %s1920_s18 = sphi %s1985_s18, %s2303_s18  }
   0xd   : > { %p51_p0 = scmp.ne.s32.totalorder %s1928_s20, %s1924_s19  ;;  %p52_p1 = scmp.eq.s32.totalorder %s1940_s23, 0 }
   0xe   : > { %p57_p2 = scmp.ne.s32.totalorder %s1924_s19, %s1920_s18  ;;  %p58_p3 = scmp.eq.s32.totalorder %s2014_s24, 0 }
   0xf   : > { %p2022_p4 = por %p52_p1, %p51_p0  ;;  %p1182_p5 = scmp.ge.s32.totalorder %s1940_s23, 1 }
  0x10   : > { %p2029_p6 = por %p58_p3, %p57_p2  ;;  %p183_p7 = scmp.lt.s32.totalorder %s1940_s23, 3 }
  0x11   : > { %s2294_s2 = sld [smem:[#allocation20_spill]]  ;;  %s1942_s7 = smov [#allocation8]  }
  0x12   : > { %p2037_p8 = pnand %p1182_p5, %p183_p7  ;;  %s197_s8 = sshll.u32 %s1942_s7, 4  ;;  %s198_s8 = int_to_ptr.vmem [resolvable:$true] %s197_s8 }
  0x13   : > { %p1659_p10 = scmp.lt.s32.totalorder %s1940_s23, 2  ;;  %s2296_s3 = sld [smem:[#allocation21_spill]] }
  0x14   : > { %p1643_p9 = pneg %p2037_p8  ;;  %s1943_s13 = smov [#allocation9]  }
  0x15   : > { %p2051_p12 = pnand %p1659_p10, %p2022_p4  ;;  %s208_s14 = sshll.u32 %s1943_s13, 4  ;;  %s209_s14 = int_to_ptr.vmem [resolvable:$true] %s208_s14 }
  0x16   : > { %p1644_p11 = pnand %p1643_p9, %p58_p3  ;;  %s1944_s15 = smov 64  }
  0x17   : > { %s195_s30 = sshll.u32 %s2294_s2, 4  ;;  %s1945_s16 = smov 4   ;;  %s196_s30 = int_to_ptr.hbm [resolvable:$true] %s195_s30 }
  0x18   : > { %1646 = dma.hbm_to_vmem [thread:$0]  (!%p1644_p11), %s196_s30, 32, %s198_s8, [#allocation7]  }
  0x19   : > { %s206_s11 = sshll.u32 %s2296_s3, 4  ;;  %s225_s17 = sand.u32 1, %s1928_s20   ;;  %s207_s11 = int_to_ptr.hbm [resolvable:$true] %s206_s11 }
  0x1a   : > { %1649 = dma.hbm_to_vmem [thread:$0]  (!%p1644_p11), %s207_s11, 2048, %s209_s14, [#allocation10], %s1944_s15, %s1944_s15, %s1945_s16  }
  0x1b   : > { %s32_s18 = sadd.s32 1, %s1936_s22  ;;  %s1186_s28 = sshll.u32 %s225_s17, 5 }
  0x1c   : > { %p33_p13 = scmp.ge.s32.totalorder %s32_s18, 2  ;;  %s1540_s26 = sshll.u32 %s1936_s22, 4 }
  0x1d   : > { %s2299_s0 = sld [smem:[#allocation19_spill]]  ;;  %s229_s8 = scalar_lea.vmem [#allocation3], %s1186_s28 }
  0x1e   : > { %s2309_s18 = smov (%p33_p13, %s32_s18), 0  ;;  %s240_s9 = sshll.u32 %s229_s8, 4  ;;  %s241_s9 = int_to_ptr.vmem [resolvable:$true] %s240_s9 }
  0x1f   : > { %2298 = sst [smem:[#allocation17_spill]] %s2309_s18  ;;  %s40_s10 = ssub.s32 %s1936_s22, %s2309_s18 }
  0x20   : > { %p42_p0 = scmp.eq.s32.totalorder %s40_s10, 0  ;;  %s226_s14 = scalar_lea.sflag [#allocation4], %s225_s17 }
  0x21   : > { %s1946_s15 = smov 512   ;;  %s1947_s16 = smov 256  }
  0x22   : > { %s2068_s11 = scalar_select %p42_p0, %s1928_s20, %s44_s25  }
  0x23   : > { %s237_s7 = scalar_lea.hbm %s2299_s0, %s1540_s26  ;;  %s1948_s2 = smov 16  }
  0x24   : > { %s238_s13 = sshll.u32 %s237_s7, 4  ;;  %2300 = sst [smem:[#allocation18_spill]] %s2068_s11  ;;  %s239_s13 = int_to_ptr.hbm [resolvable:$true] %s238_s13 }
  0x25   : > { %1653 = dma.hbm_to_vmem [thread:$0]  (!%p2051_p12), %s239_s13, 512, %s241_s9, %s226_s14, %s1946_s15, %s1947_s16, %s1948_s2  }
  0x26   : > { %s250_s29 = sand.u32 1, %s1940_s23   ;;  %s1189_s26 = sshll.u32 %s225_s17, 9 }
  0x27   : > { %s1542_s30 = sshll.u32 %s1936_s22, 9  ;;  %s254_s28 = scalar_lea.vmem [#allocation6], %s1189_s26 }
  0x28   : > { %s263_s8 = sshll.u32 %s254_s28, 4  ;;  %s260_s10 = scalar_lea.hbm %s2283_s1, %s1542_s30  ;;  %s264_s8 = int_to_ptr.vmem [resolvable:$true] %s263_s8 }
  0x29   : > { %s261_s3 = sshll.u32 %s260_s10, 4  ;;  %s251_s25 = scalar_lea.sflag [#allocation7], %s250_s29  ;;  %s262_s3 = int_to_ptr.hbm [resolvable:$true] %s261_s3 }
  0x2a   : > { %s1949_s18 = smov 128   ;;  %s1950_s11 = smov 8  }
  0x2b   : > { %1656 = dma.hbm_to_vmem [thread:$0]  (!%p2051_p12), %s262_s3, 8192, %s264_s8, %s251_s25, %s1949_s18, %s1949_s18, %s1950_s11  }
  0x2c   : > { %275 = sbr.rel (%p2037_p8) target bundleno = 463 (0x1cf), region = 40  ;;  %s277_s2 = sand.u32 (!%p2037_p8), 1, %s1924_s19  }
  0x2d   : > { %s1194_s17 = sshll.u32 (!%p2037_p8), %s277_s2, 5  ;;  %s278_s9 = scalar_lea.sflag (!%p2037_p8), [#allocation4], %s277_s2 }
  0x2e   : > { %s2082_s13 = scalar_lea.vmem (!%p2037_p8), [#allocation3], %s1194_s17 }
  0x31   : > { %1899 = dma.done.wait (%p2029_p6), %s278_s9, 512  }
  0x32   : > { %1901 = vsyncadd (%p2029_p6), %s278_s9, 4294966784  ;;  %s287_s0 = sand.u32 1, %s2014_s24   ;;  %s1195_s12 = sshll.u32 %s277_s2, 9 }
  0x33   : > { %s288_s3 = scalar_lea.sflag [#allocation7], %s287_s0  ;;  %s2089_s18 = scalar_lea.vmem [#allocation6], %s1195_s12 }
  0x34   : > { %1903 = dma.done.wait (%p2029_p6), %s288_s3, 8192  }
  0x35   : > { %1905 = vsyncadd (%p2029_p6), %s288_s3, 4294959104 }
  0x36   : > { %1907 = dma.done.wait (%p58_p3), [#allocation7], 32  }
  0x37   : > { %1909 = vsyncadd (%p58_p3), [#allocation7], 4294967264 }
  0x38   : > { %1911 = dma.done.wait (%p58_p3), [#allocation10], 2048  }
  0x39   : > { %1913 = vsyncadd (%p58_p3), [#allocation10], 4294965248  ;;  %p1198_p1 = scmp.ne.s32.totalorder %s1932_s21, 0 }
  0x3b   : > { %336 = sbr.rel (%p1198_p1) target bundleno = 69 (0x45), region = 60 }
  0x40   : > { %v1951_v0 = vmov 0.0  }
  0x41   : > { %337 = vst [vmem:[#allocation2 + $0x10] sm:$0xff] %v1951_v0 }
  0x42   : > { %338 = vst [vmem:[#allocation2] sm:$0xff] %v1951_v0 }
  0x43   : > { %339 = vst [vmem:[#allocation2 + $0x18] sm:$0xff] %v1951_v0 }
  0x44   : > { %340 = vst [vmem:[#allocation2 + $0x8] sm:$0xff] %v1951_v0 }
  0x45 PF: > { %v1273_v1 = vld [vmem:[%s2089_s18 + $0x70] sm:$0xf]  ;;  %v1562_v2 = vld [vmem:[%s2089_s18 + $0x74] sm:$0xf0]  ;;  %v1265_v12 = vld [vmem:[%s2089_s18 + $0x60] sm:$0xf] }
  0x46   : > { %v1337_v3 = vld [vmem:[%s2089_s18 + $0xf0] sm:$0xf]  ;;  %v1274_v4 = vor.u32 %v1562_v2, %v1273_v1  ;;  %v1578_v5 = vld [vmem:[%s2089_s18 + $0xf4] sm:$0xf0]  ;;  %v1560_v14 = vld [vmem:[%s2089_s18 + $0x64] sm:$0xf0] }
  0x47   : > { %v1401_v6 = vld [vmem:[%s2089_s18 + $0x170] sm:$0xf]  ;;  %v1594_v7 = vld [vmem:[%s2089_s18 + $0x174] sm:$0xf0]  ;;  %v1338_v8 = vor.u32 %v1578_v5, %v1337_v3  ;;  %v1329_v15 = vld [vmem:[%s2089_s18 + $0xe0] sm:$0xf]  ;;  %v1266_v17 = vor.u32 %v1560_v14, %v1265_v12 }
  0x48   : > { %v1402_v9 = vor.u32 %v1594_v7, %v1401_v6  ;;  %v1465_v10 = vld [vmem:[%s2089_s18 + $0x1f0] sm:$0xf]  ;;  %v1610_v11 = vld [vmem:[%s2089_s18 + $0x1f4] sm:$0xf0]  ;;  %753 = vmatpush.bf16.msra.mxu0 %v1274_v4  ;;  %v1576_v16 = vld [vmem:[%s2089_s18 + $0xe4] sm:$0xf0] }
  0x49   : > { %v1466_v13 = vor.u32 %v1610_v11, %v1465_v10  ;;  %767 = vmatpush.bf16.msra.mxu1 %v1338_v8  ;;  %v1330_v18 = vor.u32 %v1576_v16, %v1329_v15  ;;  %v1393_v19 = vld [vmem:[%s2089_s18 + $0x160] sm:$0xf]  ;;  %v1592_v20 = vld [vmem:[%s2089_s18 + $0x164] sm:$0xf0]  ;;  %v1257_v24 = vld [vmem:[%s2089_s18 + $0x50] sm:$0xf] }
  0x4a   : > { %781 = vmatpush.bf16.msra.mxu2 %v1402_v9  ;;  %v1457_v21 = vld [vmem:[%s2089_s18 + $0x1e0] sm:$0xf]  ;;  %v1394_v22 = vor.u32 %v1592_v20, %v1393_v19  ;;  %v1608_v23 = vld [vmem:[%s2089_s18 + $0x1e4] sm:$0xf0]  ;;  %v1558_v25 = vld [vmem:[%s2089_s18 + $0x54] sm:$0xf0] }
  0x4b   : > { %795 = vmatpush.bf16.msra.mxu3 %v1466_v13  ;;  %v1458_v26 = vor.u32 %v1608_v23, %v1457_v21  ;;  %v1321_v27 = vld [vmem:[%s2089_s18 + $0xd0] sm:$0xf]  ;;  %v1574_v28 = vld [vmem:[%s2089_s18 + $0xd4] sm:$0xf0]  ;;  %v1258_v30 = vor.u32 %v1558_v25, %v1257_v24  ;;  %v1249_v36 = vld [vmem:[%s2089_s18 + $0x40] sm:$0xf] }
  0x4c   : > { %v1385_v29 = vld [vmem:[%s2089_s18 + $0x150] sm:$0xf]  ;;  %754 = vmatpush.bf16.msra.mxu0 %v1266_v17  ;;  %v1590_v31 = vld [vmem:[%s2089_s18 + $0x154] sm:$0xf0]  ;;  %v1322_v34 = vor.u32 %v1574_v28, %v1321_v27  ;;  %v1556_v37 = vld [vmem:[%s2089_s18 + $0x44] sm:$0xf0] }
  0x4d   : > { %v1449_v32 = vld [vmem:[%s2089_s18 + $0x1d0] sm:$0xf]  ;;  %v1606_v33 = vld [vmem:[%s2089_s18 + $0x1d4] sm:$0xf0]  ;;  %768 = vmatpush.bf16.msra.mxu1 %v1330_v18  ;;  %v1386_v35 = vor.u32 %v1590_v31, %v1385_v29  ;;  %v1313_v38 = vld [vmem:[%s2089_s18 + $0xc0] sm:$0xf]  ;;  %v1250_v45 = vor.u32 %v1556_v37, %v1249_v36 }
  0x4e   : > { %782 = vmatpush.bf16.msra.mxu2 %v1394_v22  ;;  %v1450_v39 = vor.u32 %v1606_v33, %v1449_v32  ;;  %v1572_v40 = vld [vmem:[%s2089_s18 + $0xc4] sm:$0xf0]  ;;  %v1377_v41 = vld [vmem:[%s2089_s18 + $0x140] sm:$0xf]  ;;  %v1241_v48 = vld [vmem:[%s2089_s18 + $0x30] sm:$0xf] }
  0x4f   : > { %796 = vmatpush.bf16.msra.mxu3 %v1458_v26  ;;  %v1588_v42 = vld [vmem:[%s2089_s18 + $0x144] sm:$0xf0]  ;;  %v1441_v43 = vld [vmem:[%s2089_s18 + $0x1c0] sm:$0xf]  ;;  %v1314_v46 = vor.u32 %v1572_v40, %v1313_v38  ;;  %v1554_v49 = vld [vmem:[%s2089_s18 + $0x34] sm:$0xf0] }
  0x50   : > { %v1604_v44 = vld [vmem:[%s2089_s18 + $0x1c4] sm:$0xf0]  ;;  %755 = vmatpush.bf16.msra.mxu0 %v1258_v30  ;;  %v1378_v47 = vor.u32 %v1588_v42, %v1377_v41  ;;  %v1305_v50 = vld [vmem:[%s2089_s18 + $0xb0] sm:$0xf]  ;;  %v1570_v52 = vld [vmem:[%s2089_s18 + $0xb4] sm:$0xf0]  ;;  %v1242_v57 = vor.u32 %v1554_v49, %v1241_v48 }
  0x51   : > { %769 = vmatpush.bf16.msra.mxu1 %v1322_v34  ;;  %v1442_v51 = vor.u32 %v1604_v44, %v1441_v43  ;;  %v1369_v53 = vld [vmem:[%s2089_s18 + $0x130] sm:$0xf]  ;;  %v1586_v54 = vld [vmem:[%s2089_s18 + $0x134] sm:$0xf0]  ;;  %v1306_v58 = vor.u32 %v1570_v52, %v1305_v50  ;;  %v1233_v60 = vld [vmem:[%s2089_s18 + $0x20] sm:$0xf] }
  0x52   : > { %783 = vmatpush.bf16.msra.mxu2 %v1386_v35  ;;  %v1433_v55 = vld [vmem:[%s2089_s18 + $0x1b0] sm:$0xf]  ;;  %v1602_v56 = vld [vmem:[%s2089_s18 + $0x1b4] sm:$0xf0]  ;;  %v1370_v59 = vor.u32 %v1586_v54, %v1369_v53  ;;  %v1552_v61 = vld [vmem:[%s2089_s18 + $0x24] sm:$0xf0] }
  0x53   : > { %797 = vmatpush.bf16.msra.mxu3 %v1450_v39  ;;  %v1297_v62 = vld [vmem:[%s2089_s18 + $0xa0] sm:$0xf]  ;;  %v1434_v63 = vor.u32 %v1602_v56, %v1433_v55  ;;  %v1568_v0 = vld [vmem:[%s2089_s18 + $0xa4] sm:$0xf0]  ;;  %v1234_v5 = vor.u32 %v1552_v61, %v1233_v60  ;;  %v1225_v8 = vld [vmem:[%s2089_s18 + $0x10] sm:$0xf] }
  0x54   : > { %756 = vmatpush.bf16.msra.mxu0 %v1250_v45  ;;  %v1361_v1 = vld [vmem:[%s2089_s18 + $0x120] sm:$0xf]  ;;  %v1584_v2 = vld [vmem:[%s2089_s18 + $0x124] sm:$0xf0]  ;;  %v1298_v6 = vor.u32 %v1568_v0, %v1297_v62  ;;  %v1550_v9 = vld [vmem:[%s2089_s18 + $0x14] sm:$0xf0] }
  0x55   : > { %770 = vmatpush.bf16.msra.mxu1 %v1314_v46  ;;  %v1425_v3 = vld [vmem:[%s2089_s18 + $0x1a0] sm:$0xf]  ;;  %v1600_v4 = vld [vmem:[%s2089_s18 + $0x1a4] sm:$0xf0]  ;;  %v1362_v7 = vor.u32 %v1584_v2, %v1361_v1  ;;  %v1289_v10 = vld [vmem:[%s2089_s18 + $0x90] sm:$0xf]  ;;  %v1226_v18 = vor.u32 %v1550_v9, %v1225_v8 }
  0x56   : > { %784 = vmatpush.bf16.msra.mxu2 %v1378_v47  ;;  %v1426_v11 = vor.u32 %v1600_v4, %v1425_v3  ;;  %v1566_v12 = vld [vmem:[%s2089_s18 + $0x94] sm:$0xf0]  ;;  %v1353_v13 = vld [vmem:[%s2089_s18 + $0x110] sm:$0xf]  ;;  %v1217_v17 = vld [vmem:[%s2089_s18] sm:$0xf] }
  0x57   : > { %798 = vmatpush.bf16.msra.mxu3 %v1442_v51  ;;  %v1582_v14 = vld [vmem:[%s2089_s18 + $0x114] sm:$0xf0]  ;;  %v1417_v15 = vld [vmem:[%s2089_s18 + $0x190] sm:$0xf]  ;;  %v1548_v19 = vld [vmem:[%s2089_s18 + $0x4] sm:$0xf0]  ;;  %v1290_v22 = vor.u32 %v1566_v12, %v1289_v10 }
  0x58   : > { %757 = vmatpush.bf16.msra.mxu0 %v1242_v57  ;;  %v1598_v16 = vld [vmem:[%s2089_s18 + $0x194] sm:$0xf0]  ;;  %v1281_v20 = vld [vmem:[%s2089_s18 + $0x80] sm:$0xf]  ;;  %v1564_v21 = vld [vmem:[%s2089_s18 + $0x84] sm:$0xf0]  ;;  %v1354_v23 = vor.u32 %v1582_v14, %v1353_v13  ;;  %v1218_v34 = vor.u32 %v1548_v19, %v1217_v17 }
  0x59   : > { %771 = vmatpush.bf16.msra.mxu1 %v1306_v58  ;;  %v1345_v24 = vld [vmem:[%s2089_s18 + $0x100] sm:$0xf]  ;;  %v1580_v25 = vld [vmem:[%s2089_s18 + $0x104] sm:$0xf0]  ;;  %v1418_v27 = vor.u32 %v1598_v16, %v1417_v15  ;;  %v1561_v29 = vld [vmem:[%s2089_s18 + $0x74] sm:$0xf]  ;;  %v1282_v38 = vor.u32 %v1564_v21, %v1281_v20 }
  0x5a   : > { %785 = vmatpush.bf16.msra.mxu2 %v1370_v59  ;;  %v1409_v26 = vld [vmem:[%s2089_s18 + $0x180] sm:$0xf]  ;;  %v1596_v28 = vld [vmem:[%s2089_s18 + $0x184] sm:$0xf0]  ;;  %v1275_v30 = vld [vmem:[%s2089_s18 + $0x78] sm:$0xf0]  ;;  %v1346_v39 = vor.u32 %v1580_v25, %v1345_v24 }
  0x5b   : > { %799 = vmatpush.bf16.msra.mxu3 %v1434_v63  ;;  %v1577_v31 = vld [vmem:[%s2089_s18 + $0xf4] sm:$0xf]  ;;  %v1339_v32 = vld [vmem:[%s2089_s18 + $0xf8] sm:$0xf0]  ;;  %v1559_v40 = vld [vmem:[%s2089_s18 + $0x64] sm:$0xf]  ;;  %v1410_v44 = vor.u32 %v1596_v28, %v1409_v26  ;;  %v1278_v45 = vor.u32 %v1561_v29, %v1275_v30 }
  0x5c   : > { %758 = vmatpush.bf16.msra.mxu0 %v1234_v5  ;;  %v1593_v33 = vld [vmem:[%s2089_s18 + $0x174] sm:$0xf]  ;;  %v1403_v35 = vld [vmem:[%s2089_s18 + $0x178] sm:$0xf0]  ;;  %v1267_v41 = vld [vmem:[%s2089_s18 + $0x68] sm:$0xf0]  ;;  %v1342_v50 = vor.u32 %v1577_v31, %v1339_v32 }
  0x5d   : > { %772 = vmatpush.bf16.msra.mxu1 %v1298_v6  ;;  %v1609_v36 = vld [vmem:[%s2089_s18 + $0x1f4] sm:$0xf]  ;;  %v1467_v37 = vld [vmem:[%s2089_s18 + $0x1f8] sm:$0xf0]  ;;  %v1209_v42 = vld [vmem:[%s2082_s13 + $0x8] sm:$0xf]  ;;  %v1406_v51 = vor.u32 %v1593_v33, %v1403_v35  ;;  %v1270_v0 = vor.u32 %v1559_v40, %v1267_v41 }
  0x5e   : > { %786 = vmatpush.bf16.msra.mxu2 %v1362_v7  ;;  %v1546_v43 = vld [vmem:[%s2082_s13 + $0x14] sm:$0xf0]  ;;  %v1575_v46 = vld [vmem:[%s2089_s18 + $0xe4] sm:$0xf]  ;;  %v1331_v47 = vld [vmem:[%s2089_s18 + $0xe8] sm:$0xf0]  ;;  %v1470_v55 = vor.u32 %v1609_v36, %v1467_v37 }
  0x5f   : > { %800 = vmatpush.bf16.msra.mxu3 %v1426_v11  ;;  %v1591_v48 = vld [vmem:[%s2089_s18 + $0x164] sm:$0xf]  ;;  %v1395_v49 = vld [vmem:[%s2089_s18 + $0x168] sm:$0xf0]  ;;  %v1211_v53 = vld [vmem:[%s2082_s13 + $0x18] sm:$0xf0]  ;;  %v2187_v56 = vor.u32 %v1546_v43, %v1209_v42  ;;  %v1334_v2 = vor.u32 %v1575_v46, %v1331_v47 }
  0x60   : > { %759 = vmatpush.bf16.msra.mxu0 %v1226_v18  ;;  %v1544_v52 = vld [vmem:[%s2082_s13 + $0xc] sm:$0xf]  ;;  %v1201_v54 = vld [vmem:[%s2082_s13] sm:$0xf]  ;;  %v1545_v57 = vld [vmem:[%s2082_s13 + $0xc] sm:$0xf0]  ;;  %v1398_v3 = vor.u32 %v1591_v48, %v1395_v49 }
  0x61   : > { %773 = vmatpush.bf16.msra.mxu1 %v1290_v22  ;;  %v1543_v58 = vld [vmem:[%s2082_s13 + $0x4] sm:$0xf]  ;;  %v1203_v59 = vld [vmem:[%s2082_s13 + $0x10] sm:$0xf0]  ;;  %v1459_v61 = vld [vmem:[%s2089_s18 + $0x1e8] sm:$0xf0]  ;;  %v2194_v62 = vor.u32 %v1544_v52, %v1211_v53  ;;  %v2196_v63 = vor.u32 %v1545_v57, %v1201_v54 }
  0x62   : > { %787 = vmatpush.bf16.msra.mxu2 %v1354_v23  ;;  %v1607_v60 = vld [vmem:[%s2089_s18 + $0x1e4] sm:$0xf]  ;;  %v2198_v1 = vor.u32 %v1543_v58, %v1203_v59  ;;  %v1557_v4 = vld [vmem:[%s2089_s18 + $0x54] sm:$0xf]  ;;  %v1259_v5 = vld [vmem:[%s2089_s18 + $0x58] sm:$0xf0] }
  0x63   : > { %801 = vmatpush.bf16.msra.mxu3 %v1418_v27  ;;  %v1573_v6 = vld [vmem:[%s2089_s18 + $0xd4] sm:$0xf]  ;;  %v1462_v7 = vor.u32 %v1607_v60, %v1459_v61  ;;  %v1323_v8 = vld [vmem:[%s2089_s18 + $0xd8] sm:$0xf0]  ;;  %v1262_v13 = vor.u32 %v1557_v4, %v1259_v5  ;;  %v1555_v16 = vld [vmem:[%s2089_s18 + $0x44] sm:$0xf] }
  0x64   : > { %760 = vmatpush.bf16.msra.mxu0 %v1218_v34  ;;  %v1589_v9 = vld [vmem:[%s2089_s18 + $0x154] sm:$0xf]  ;;  %v1387_v10 = vld [vmem:[%s2089_s18 + $0x158] sm:$0xf0]  ;;  %v1326_v14 = vor.u32 %v1573_v6, %v1323_v8  ;;  %v1251_v17 = vld [vmem:[%s2089_s18 + $0x48] sm:$0xf0] }
  0x65   : > { %774 = vmatpush.bf16.msra.mxu1 %v1282_v38  ;;  %v1605_v11 = vld [vmem:[%s2089_s18 + $0x1d4] sm:$0xf]  ;;  %v1451_v12 = vld [vmem:[%s2089_s18 + $0x1d8] sm:$0xf0]  ;;  %v1390_v15 = vor.u32 %v1589_v9, %v1387_v10  ;;  %v1571_v18 = vld [vmem:[%s2089_s18 + $0xc4] sm:$0xf]  ;;  %v1254_v25 = vor.u32 %v1555_v16, %v1251_v17 }
  0x66   : > { %788 = vmatpush.bf16.msra.mxu2 %v1346_v39  ;;  %v1454_v19 = vor.u32 %v1605_v11, %v1451_v12  ;;  %v1315_v20 = vld [vmem:[%s2089_s18 + $0xc8] sm:$0xf0]  ;;  %v1587_v21 = vld [vmem:[%s2089_s18 + $0x144] sm:$0xf]  ;;  %v1553_v28 = vld [vmem:[%s2089_s18 + $0x34] sm:$0xf] }
  0x67   : > { %802 = vmatpush.bf16.msra.mxu3 %v1410_v44  ;;  %761 = vmatmul.bf16.vlgmr.msra.gmra.mxu0 %v2196_v63  ;;  %v1379_v22 = vld [vmem:[%s2089_s18 + $0x148] sm:$0xf0]  ;;  %v1603_v23 = vld [vmem:[%s2089_s18 + $0x1c4] sm:$0xf]  ;;  %v1318_v26 = vor.u32 %v1571_v18, %v1315_v20  ;;  %v1243_v29 = vld [vmem:[%s2089_s18 + $0x38] sm:$0xf0] }
  0x68   : > { %809 = vmatpush.bf16.msrb.mxu0 %v1278_v45  ;;  %775 = vmatmul.bf16.vlgmr.msra.gmra.mxu1 %v2198_v1  ;;  %v1443_v24 = vld [vmem:[%s2089_s18 + $0x1c8] sm:$0xf0]  ;;  %v1382_v27 = vor.u32 %v1587_v21, %v1379_v22  ;;  %v1569_v30 = vld [vmem:[%s2089_s18 + $0xb4] sm:$0xf]  ;;  %v1307_v32 = vld [vmem:[%s2089_s18 + $0xb8] sm:$0xf0]  ;;  %v1246_v37 = vor.u32 %v1553_v28, %v1243_v29 }
  0x69   : > { %823 = vmatpush.bf16.msrb.mxu1 %v1342_v50  ;;  %789 = vmatmul.bf16.vlgmr.msra.gmra.mxu2 %v2187_v56  ;;  %v1446_v31 = vor.u32 %v1603_v23, %v1443_v24  ;;  %v1585_v33 = vld [vmem:[%s2089_s18 + $0x134] sm:$0xf]  ;;  %v1371_v34 = vld [vmem:[%s2089_s18 + $0x138] sm:$0xf0]  ;;  %v1310_v38 = vor.u32 %v1569_v30, %v1307_v32  ;;  %v1551_v40 = vld [vmem:[%s2089_s18 + $0x24] sm:$0xf] }
  0x6a   : > { %837 = vmatpush.bf16.msrb.mxu2 %v1406_v51  ;;  %803 = vmatmul.bf16.vlgmr.msra.gmra.mxu3 %v2194_v62  ;;  %v1601_v35 = vld [vmem:[%s2089_s18 + $0x1b4] sm:$0xf]  ;;  %v1435_v36 = vld [vmem:[%s2089_s18 + $0x1b8] sm:$0xf0]  ;;  %v1374_v39 = vor.u32 %v1585_v33, %v1371_v34  ;;  %v1235_v41 = vld [vmem:[%s2089_s18 + $0x28] sm:$0xf0] }
  0x6b   : > { %851 = vmatpush.bf16.msrb.mxu3 %v1470_v55  ;;  %v1567_v42 = vld [vmem:[%s2089_s18 + $0xa4] sm:$0xf]  ;;  %v1438_v43 = vor.u32 %v1601_v35, %v1435_v36  ;;  %v1299_v44 = vld [vmem:[%s2089_s18 + $0xa8] sm:$0xf0]  ;;  %v1238_v49 = vor.u32 %v1551_v40, %v1235_v41  ;;  %v1549_v52 = vld [vmem:[%s2089_s18 + $0x14] sm:$0xf] }
  0x6c   : > { %810 = vmatpush.bf16.msrb.mxu0 %v1270_v0  ;;  %v1583_v45 = vld [vmem:[%s2089_s18 + $0x124] sm:$0xf]  ;;  %v1363_v46 = vld [vmem:[%s2089_s18 + $0x128] sm:$0xf0]  ;;  %v1302_v50 = vor.u32 %v1567_v42, %v1299_v44  ;;  %v1227_v53 = vld [vmem:[%s2089_s18 + $0x18] sm:$0xf0] }
  0x6d   : > { %824 = vmatpush.bf16.msrb.mxu1 %v1334_v2  ;;  %v1599_v47 = vld [vmem:[%s2089_s18 + $0x1a4] sm:$0xf]  ;;  %v1427_v48 = vld [vmem:[%s2089_s18 + $0x1a8] sm:$0xf0]  ;;  %v1366_v51 = vor.u32 %v1583_v45, %v1363_v46  ;;  %v1565_v54 = vld [vmem:[%s2089_s18 + $0x94] sm:$0xf]  ;;  %v1230_v0 = vor.u32 %v1549_v52, %v1227_v53 }
  0x6e   : > { %838 = vmatpush.bf16.msrb.mxu2 %v1398_v3  ;;  %v1430_v55 = vor.u32 %v1599_v47, %v1427_v48  ;;  %v1291_v57 = vld [vmem:[%s2089_s18 + $0x98] sm:$0xf0]  ;;  %v1581_v58 = vld [vmem:[%s2089_s18 + $0x114] sm:$0xf]  ;;  %v1547_v4 = vld [vmem:[%s2089_s18 + $0x4] sm:$0xf] }
  0x6f   : > { %852 = vmatpush.bf16.msrb.mxu3 %v1462_v7  ;;  %v1355_v59 = vld [vmem:[%s2089_s18 + $0x118] sm:$0xf0]  ;;  %v1597_v60 = vld [vmem:[%s2089_s18 + $0x194] sm:$0xf]  ;;  %v1294_v2 = vor.u32 %v1565_v54, %v1291_v57  ;;  %v1219_v5 = vld [vmem:[%s2089_s18 + $0x8] sm:$0xf0] }
  0x70   : > { %811 = vmatpush.bf16.msrb.mxu0 %v1262_v13  ;;  %v1419_v61 = vld [vmem:[%s2089_s18 + $0x198] sm:$0xf0]  ;;  %v1358_v3 = vor.u32 %v1581_v58, %v1355_v59  ;;  %v1563_v6 = vld [vmem:[%s2089_s18 + $0x84] sm:$0xf]  ;;  %v1283_v8 = vld [vmem:[%s2089_s18 + $0x88] sm:$0xf0]  ;;  %v1222_v13 = vor.u32 %v1547_v4, %v1219_v5 }
  0x71   : > { %825 = vmatpush.bf16.msrb.mxu1 %v1326_v14  ;;  %v1422_v7 = vor.u32 %v1597_v60, %v1419_v61  ;;  %v1579_v9 = vld [vmem:[%s2089_s18 + $0x104] sm:$0xf]  ;;  %v1347_v10 = vld [vmem:[%s2089_s18 + $0x108] sm:$0xf0]  ;;  %v1286_v14 = vor.u32 %v1563_v6, %v1283_v8  ;;  %v341_v23 = vld [vmem:[#allocation2 + $0x10] sm:$0xff]  ;;  %p1471_p2 = scmp.ne.s32.totalorder %s1932_s21, 1 }
  0x72   : > { %839 = vmatpush.bf16.msrb.mxu2 %v1390_v15  ;;  %v1595_v11 = vld [vmem:[%s2089_s18 + $0x184] sm:$0xf]  ;;  %v1411_v12 = vld [vmem:[%s2089_s18 + $0x188] sm:$0xf0]  ;;  %v1350_v15 = vor.u32 %v1579_v9, %v1347_v10  ;;  %v343_v30 = vld [vmem:[#allocation2 + $0x18] sm:$0xff] }
  0x73   : > { %853 = vmatpush.bf16.msrb.mxu3 %v1454_v19  ;;  %v1414_v16 = vor.u32 %v1595_v11, %v1411_v12  ;;  %v344_v45 = vld [vmem:[#allocation2 + $0x8] sm:$0xff] }
  0x74   : > { %812 = vmatpush.bf16.msrb.mxu0 %v1254_v25 }
  0x75   : > { %826 = vmatpush.bf16.msrb.mxu1 %v1318_v26 }
  0x76   : > { %840 = vmatpush.bf16.msrb.mxu2 %v1382_v27 }
  0x77   : > { %854 = vmatpush.bf16.msrb.mxu3 %v1446_v31 }
  0x78   : > { %813 = vmatpush.bf16.msrb.mxu0 %v1246_v37  ;;  %v342_v37 = vld [vmem:[#allocation2] sm:$0xff] }
  0x79   : > { %827 = vmatpush.bf16.msrb.mxu1 %v1310_v38 }
  0x7a   : > { %841 = vmatpush.bf16.msrb.mxu2 %v1374_v39 }
  0x7b   : > { %855 = vmatpush.bf16.msrb.mxu3 %v1438_v43 }
  0x7c   : > { %814 = vmatpush.bf16.msrb.mxu0 %v1238_v49 }
  0x7d   : > { %828 = vmatpush.bf16.msrb.mxu1 %v1302_v50 }
  0x7e   : > { %842 = vmatpush.bf16.msrb.mxu2 %v1366_v51 }
  0x7f   : > { %856 = vmatpush.bf16.msrb.mxu3 %v1430_v55 }
  0x80   : > { %815 = vmatpush.bf16.msrb.mxu0 %v1230_v0 }
  0x81   : > { %829 = vmatpush.bf16.msrb.mxu1 %v1294_v2 }
  0x82   : > { %843 = vmatpush.bf16.msrb.mxu2 %v1358_v3 }
  0x83   : > { %857 = vmatpush.bf16.msrb.mxu3 %v1422_v7 }
  0x84   : > { %816 = vmatpush.bf16.msrb.mxu0 %v1222_v13 }
  0x85   : > { %830 = vmatpush.bf16.msrb.mxu1 %v1286_v14 }
  0x86   : > { %844 = vmatpush.bf16.msrb.mxu2 %v1350_v15 }
  0x87   : > { %858 = vmatpush.bf16.msrb.mxu3 %v1414_v16  ;;  %817 = vmatmul.bf16.vlgmr.msrb.gmra.mxu0 %v2196_v63 }
  0x88   : > { %831 = vmatmul.bf16.vlgmr.msrb.gmra.mxu1 %v2198_v1 }
  0x89   : > { %845 = vmatmul.bf16.vlgmr.msrb.gmra.mxu2 %v2187_v56 }
  0x8a   : > { %859 = vmatmul.bf16.vlgmr.msrb.gmra.mxu3 %v2194_v62 }
  0xe4   : > { %v762_v17 = vpop.f32.mrf.mxu0 }
  0xe5   : > { %v776_v18 = vpop.f32.mrf.mxu1 }
  0xe6   : > { %v777_v19 = vadd.f32 %v776_v18, %v762_v17 }
  0xec   : > { %v790_v20 = vpop.f32.mrf.mxu2  ;;  %v764_v25 = vpop.f32.mrf.mxu0 }
  0xed   : > { %v791_v21 = vadd.f32 %v790_v20, %v777_v19  ;;  %v804_v22 = vpop.f32.mrf.mxu3  ;;  %v778_v26 = vpop.f32.mrf.mxu1 }
  0xee   : > { %v779_v28 = vadd.f32 %v778_v26, %v764_v25 }
  0xef   : > { %v805_v24 = vadd.f32 %v804_v22, %v791_v21 }
  0xf1   : > { %v865_v27 = vadd.f32 %v805_v24, %v341_v23 }
  0xf3   : > { %869 = vst [vmem:[#allocation2 + $0x10] sm:$0xff] %v865_v27 }
  0xf4   : > { %v792_v63 = vpop.f32.mrf.mxu2 }
  0xf5   : > { %v793_v29 = vadd.f32 %v792_v63, %v779_v28  ;;  %v806_v1 = vpop.f32.mrf.mxu3 }
  0xf7   : > { %v807_v56 = vadd.f32 %v806_v1, %v793_v29 }
  0xf9   : > { %v867_v31 = vadd.f32 %v807_v56, %v343_v30 }
  0xfb   : > { %871 = vst [vmem:[#allocation2 + $0x18] sm:$0xff] %v867_v31 }
 0x104   : > { %v818_v62 = vpop.f32.mrf.mxu0 }
 0x105   : > { %v832_v32 = vpop.f32.mrf.mxu1 }
 0x106   : > { %v833_v33 = vadd.f32 %v832_v32, %v818_v62 }
 0x10c   : > { %v846_v34 = vpop.f32.mrf.mxu2  ;;  %v820_v39 = vpop.f32.mrf.mxu0 }
 0x10d   : > { %v847_v35 = vadd.f32 %v846_v34, %v833_v33  ;;  %v860_v36 = vpop.f32.mrf.mxu3  ;;  %v834_v40 = vpop.f32.mrf.mxu1 }
 0x10e   : > { %v835_v42 = vadd.f32 %v834_v40, %v820_v39 }
 0x10f   : > { %v861_v38 = vadd.f32 %v860_v36, %v847_v35 }
 0x111   : > { %v866_v41 = vadd.f32 %v861_v38, %v342_v37 }
 0x113   : > { %870 = vst [vmem:[#allocation2] sm:$0xff] %v866_v41 }
 0x114   : > { %v848_v43 = vpop.f32.mrf.mxu2 }
 0x115   : > { %v849_v44 = vadd.f32 %v848_v43, %v835_v42  ;;  %v862_v46 = vpop.f32.mrf.mxu3 }
 0x117   : > { %v863_v47 = vadd.f32 %v862_v46, %v849_v44  ;;  %876 = sbr.rel (%p1471_p2) target bundleno = 457 (0x1c9), region = 64 }
 0x119   : > { %v868_v48 = vadd.f32 %v863_v47, %v344_v45 }
 0x11b   : > { %872 = vst [vmem:[#allocation2 + $0x8] sm:$0xff] %v868_v48 }
 0x11c   : > { %v1618_v49 = vld [vmem:[#allocation9 + $0x38] sm:$0xff]  ;;  %v1617_v51 = vld [vmem:[#allocation9 + $0x30] sm:$0xff]  ;;  %v1616_v53 = vld [vmem:[#allocation9 + $0x28] sm:$0xff] }
 0x11d   : > { %v1626_v50 = vld [vmem:[#allocation9 + $0x78] sm:$0xff]  ;;  %1029 = vmatpush.bf16.msra.mxu0 %v1618_v49  ;;  %v1625_v52 = vld [vmem:[#allocation9 + $0x70] sm:$0xff]  ;;  %v1624_v54 = vld [vmem:[#allocation9 + $0x68] sm:$0xff] }
 0x11e   : > { %1043 = vmatpush.bf16.msra.mxu1 %v1626_v50  ;;  %v1615_v55 = vld [vmem:[#allocation9 + $0x20] sm:$0xff]  ;;  %v1614_v58 = vld [vmem:[#allocation9 + $0x18] sm:$0xff]  ;;  %v1613_v61 = vld [vmem:[#allocation9 + $0x10] sm:$0xff] }
 0x11f   : > { %v1623_v57 = vld [vmem:[#allocation9 + $0x60] sm:$0xff]  ;;  %v1622_v59 = vld [vmem:[#allocation9 + $0x58] sm:$0xff]  ;;  %v1621_v0 = vld [vmem:[#allocation9 + $0x50] sm:$0xff] }
 0x120   : > { %v881_v60 = vld [vmem:[#allocation8] sm:$0x3]  ;;  %v877_v2 = vld [vmem:[#allocation2 + $0x10] sm:$0xff]  ;;  %v879_v5 = vld [vmem:[#allocation2 + $0x18] sm:$0xff] }
 0x121   : > { %1030 = vmatpush.bf16.msra.mxu0 %v1617_v51  ;;  %v883_v3 = vperm.slane %v881_v60, 0  ;;  %v884_v4 = vperm.slane %v881_v60, 1  ;;  %v878_v6 = vld [vmem:[#allocation2] sm:$0xff]  ;;  %v1612_v12 = vld [vmem:[#allocation9 + $0x8] sm:$0xff] }
 0x122   : > { %1044 = vmatpush.bf16.msra.mxu1 %v1625_v52  ;;  %v880_v7 = vld [vmem:[#allocation2 + $0x8] sm:$0xff]  ;;  %v1725_v22 = vld [vmem:[%s2286_s4] ss:$0 sm:$0xff] }
 0x123   : > { %v887_v8 = vadd.f32 %v883_v3, %v877_v2  ;;  %v889_v9 = vadd.f32 %v883_v3, %v879_v5  ;;  %v888_v10 = vadd.f32 %v884_v4, %v878_v6  ;;  %v890_v11 = vadd.f32 %v884_v4, %v880_v7  ;;  %v1620_v13 = vld [vmem:[#allocation9 + $0x48] sm:$0xff]  ;;  %v1611_v18 = vld [vmem:[#allocation9] sm:$0xff] }
 0x124   : > { %v1619_v19 = vld [vmem:[#allocation9 + $0x40] sm:$0xff] }
 0x125   : > { %1031 = vmatpush.bf16.msra.mxu0 %v1616_v53  ;;  %v891_v14 = vmax.f32 %v887_v8, 0.0  ;;  %v893_v15 = vmax.f32 %v889_v9, 0.0  ;;  %v892_v16 = vmax.f32 %v888_v10, 0.0  ;;  %v894_v17 = vmax.f32 %v890_v11, 0.0 }
 0x126   : > { %1045 = vmatpush.bf16.msra.mxu1 %v1624_v54 }
 0x127   : > { %v895_v20 = vpack.c.bf16 %v893_v15, %v891_v14  ;;  %v896_v21 = vpack.c.bf16 %v894_v17, %v892_v16 }
 0x129   : > { %1032 = vmatpush.bf16.msra.mxu0 %v1615_v55 }
 0x12a   : > { %1046 = vmatpush.bf16.msra.mxu1 %v1623_v57 }
 0x12d   : > { %1033 = vmatpush.bf16.msra.mxu0 %v1614_v58 }
 0x12e   : > { %1047 = vmatpush.bf16.msra.mxu1 %v1622_v59 }
 0x131   : > { %1034 = vmatpush.bf16.msra.mxu0 %v1613_v61 }
 0x132   : > { %1048 = vmatpush.bf16.msra.mxu1 %v1621_v0 }
 0x135   : > { %1035 = vmatpush.bf16.msra.mxu0 %v1612_v12 }
 0x136   : > { %1049 = vmatpush.bf16.msra.mxu1 %v1620_v13 }
 0x139   : > { %1036 = vmatpush.bf16.msra.mxu0 %v1611_v18 }
 0x13a   : > { %1050 = vmatpush.bf16.msra.mxu1 %v1619_v19 }
 0x13c   : > { %1037 = vmatmul.bf16.vlgmr.msra.gmra.mxu0 %v895_v20 }
 0x13d   : > { %1051 = vmatmul.bf16.vlgmr.msra.gmra.mxu1 %v896_v21 }
 0x1b9   : > { %v1038_v23 = vpop.f32.mrf.mxu0 }
 0x1ba   : > { %v1052_v24 = vpop.f32.mrf.mxu1  ;;  %v1039_v25 = vadd.f32 %v1725_v22, %v1038_v23 }
 0x1bc   : > { %v1053_v26 = vadd.f32 %v1052_v24, %v1039_v25 }
 0x1be   : > { %v1057_v27 = vmax.f32 %v1053_v26, 0.0 }
 0x1c0   : > { %1059 = vst [vmem:[#allocation11] sm:$0xff] %v1057_v27 }
 0x1c1   : > { %v1040_v28 = vpop.f32.mrf.mxu0 }
 0x1c2   : > { %v1041_v63 = vadd.f32 %v1725_v22, %v1040_v28  ;;  %v1054_v29 = vpop.f32.mrf.mxu1 }
 0x1c4   : > { %v1055_v1 = vadd.f32 %v1054_v29, %v1041_v63 }
 0x1c6   : > { %v1058_v30 = vmax.f32 %v1055_v1, 0.0 }
 0x1c8   : > { %1060 = vst [vmem:[#allocation11 + $0x8] sm:$0xff] %v1058_v30 }
 0x1c9 PF: > { %p1662_p3 = scmp.eq.s32.totalorder %s2014_s24, 1  ;;  %s1071_s14 = sshll.u32 %s2287_s5, 4  ;;  %s1072_s14 = int_to_ptr.hbm [resolvable:$true] %s1071_s14 }
 0x1ca   : > { %s1952_s15 = smov [#allocation11]   ;;  %s1953_s29 = smov 128  }
 0x1cb   : > { %s1069_s16 = sshll.u32 %s1952_s15, 4  ;;  %s1954_s26 = smov 8   ;;  %s1070_s16 = int_to_ptr.vmem [resolvable:$true] %s1069_s16 }
 0x1cc   : > { %1640 = dma.vmem_to_hbm [thread:$0]  (%p1662_p3), %s1070_s16, 256, %s1072_s14, [#allocation5], %s1953_s29, %s1953_s29, %s1954_s26  }
 0x1cd   : > { %1915 = dma.done.wait (%p1662_p3), [#allocation5], 256  }
 0x1ce   : > { %1917 = vsyncadd (%p1662_p3), [#allocation5], 4294967040 }
 0x1cf PF: > { %s23_s23 = sadd.s32 1, %s1940_s23   ;;  %s2301_s24 = sld [smem:[#allocation18_spill]] }
 0x1d0   : > { %p20_p4 = scmp.ge.s32.totalorder %s23_s23, 4   ;;  %s2302_s30 = sld [smem:[#allocation17_spill]] }
 0x1d1   : > { %s2303_s18 = smov %s1924_s19  ;;  %s2304_s19 = smov %s1928_s20 }
 0x1d2   : > { %s2306_s21 = smov %s1936_s22  ;;  %22 = sbr.rel (!%p20_p4) target bundleno = 12 (0xc), region = 107 }
 0x1d5   : > { %s2305_s20 = smov %s2301_s24 }
 0x1d6   : > { %s2307_s22 = smov %s2302_s30 }
 0x1d7   :  { %1088 = vsyncpa [#allocation4], 1 }
 0x1d8   :  { %1090 = vsyncpa [#allocation4 + $0x1], 1 }
 0x1d9   :  { %1091 = vsyncpa [#allocation7], 1 }
 0x1da   :  { %1093 = vsyncpa [#allocation7 + $0x1], 1 }
 0x1db   :  { %1094 = vsyncpa [#allocation10], 1 }
 0x1dc   :  { %1095 = vsyncpa [#allocation5], 1 }
 0x1dd   :  { %1097 = vsyncpa [#allocation5 + $0x1], 1 }

</bundles_post_ra>
